<compile_context>
chip_gen: v6e
topology: v6e:2x2x1
jax: 0.10.0
libtpu: 0.0.40
codegen_flags: <defaults>
</compile_context>

<pallas_src>
import math

import jax
import jax.numpy as jnp
from jax import lax
from jax.experimental import pallas as pl
from jax.experimental.pallas import tpu as pltpu


# ----------------------------------------------------------------------------
# Pallas kernels
# ----------------------------------------------------------------------------
def _dw3x3_kernel(x_ref, w_ref, b_ref, o_ref):
    """Depthwise 3x3 conv + bias + ReLU.  x_ref: (H+2, W+2, C) pre-padded."""
    H, W, C = o_ref.shape
    acc = jnp.zeros((H, W, C), jnp.float32)
    for kh in range(3):
        for kw in range(3):
            acc = acc + x_ref[kh:kh + H, kw:kw + W, :] * w_ref[3 * kh + kw, :]
    acc = acc + b_ref[0, :]
    o_ref[...] = jnp.maximum(acc, 0.0).astype(o_ref.dtype)


def dw_conv3x3(xp, w, b):
    """xp: (N, H+2, W+2, C) pre-padded; w: (9, C); b: (1, C) -> (N, H, W, C)."""
    N, Hp, Wp, C = xp.shape
    H, W = Hp - 2, Wp - 2
    return pl.pallas_call(
        _dw3x3_kernel,
        out_shape=jax.ShapeDtypeStruct((N, H, W, C), xp.dtype),
        grid=(N,),
        in_specs=[
            pl.BlockSpec((None, Hp, Wp, C), lambda n: (n, 0, 0, 0)),
            pl.BlockSpec((9, C), lambda n: (0, 0)),
            pl.BlockSpec((1, C), lambda n: (0, 0)),
        ],
        out_specs=pl.BlockSpec((None, H, W, C), lambda n: (n, 0, 0, 0)),
        compiler_params=pltpu.CompilerParams(
            dimension_semantics=("parallel",)),
    )(xp, w, b)


def _convdw_fused_kernel(x_ref, wdw_ref, bdw_ref, wpw_ref, bpw_ref, o_ref):
    """Fused stride-1 ConvDW: dw3x3 + bias + ReLU -> 1x1 matmul + bias + ReLU.

    x_ref: (H+2, W+2, Cin) pre-padded; the depthwise intermediate stays in
    VMEM/vregs — never written to HBM.
    """
    H, W, Cout = o_ref.shape
    Cin = x_ref.shape[-1]
    acc = jnp.zeros((H, W, Cin), jnp.float32)
    for kh in range(3):
        for kw in range(3):
            acc = acc + x_ref[kh:kh + H, kw:kw + W, :] * wdw_ref[3 * kh + kw, :]
    dw = jnp.maximum(acc + bdw_ref[0, :], 0.0)
    out = jnp.dot(dw.reshape(H * W, Cin), wpw_ref[...],
                  preferred_element_type=jnp.float32)
    out = jnp.maximum(out + bpw_ref[0, :], 0.0)
    o_ref[...] = out.reshape(H, W, Cout).astype(o_ref.dtype)


def convdw_fused(xp, wdw, bdw, wpw, bpw):
    """xp: (N, H+2, W+2, Cin); wdw: (9, Cin); wpw: (Cin, Cout)."""
    N, Hp, Wp, Cin = xp.shape
    H, W = Hp - 2, Wp - 2
    Cout = wpw.shape[1]
    return pl.pallas_call(
        _convdw_fused_kernel,
        out_shape=jax.ShapeDtypeStruct((N, H, W, Cout), xp.dtype),
        grid=(N,),
        in_specs=[
            pl.BlockSpec((None, Hp, Wp, Cin), lambda n: (n, 0, 0, 0)),
            pl.BlockSpec((9, Cin), lambda n: (0, 0)),
            pl.BlockSpec((1, Cin), lambda n: (0, 0)),
            pl.BlockSpec((Cin, Cout), lambda n: (0, 0)),
            pl.BlockSpec((1, Cout), lambda n: (0, 0)),
        ],
        out_specs=pl.BlockSpec((None, H, W, Cout), lambda n: (n, 0, 0, 0)),
        compiler_params=pltpu.CompilerParams(
            dimension_semantics=("parallel",)),
    )(xp, wdw, bdw, wpw, bpw)


def _row_tile(R):
    for cand in (512, 256, 128, 64):
        if R > cand and R % cand == 0:
            return cand
    return R


def _pointwise_kernel(x_ref, w_ref, b_ref, o_ref):
    """1x1 conv: (rows, Cin) @ (Cin, Cout) + bias + ReLU."""
    acc = jnp.dot(x_ref[...], w_ref[...], preferred_element_type=jnp.float32)
    o_ref[...] = jnp.maximum(acc + b_ref[0, :], 0.0).astype(o_ref.dtype)


def pointwise_conv(x2, w, b):
    """x2: (rows, Cin); w: (Cin, Cout); b: (1, Cout) -> (rows, Cout)."""
    R, Cin = x2.shape
    Cout = w.shape[1]
    tr = _row_tile(R)
    return pl.pallas_call(
        _pointwise_kernel,
        out_shape=jax.ShapeDtypeStruct((R, Cout), x2.dtype),
        grid=(R // tr,),
        in_specs=[
            pl.BlockSpec((tr, Cin), lambda i: (i, 0)),
            pl.BlockSpec((Cin, Cout), lambda i: (0, 0)),
            pl.BlockSpec((1, Cout), lambda i: (0, 0)),
        ],
        out_specs=pl.BlockSpec((tr, Cout), lambda i: (i, 0)),
        compiler_params=pltpu.CompilerParams(
            dimension_semantics=("parallel",)),
    )(x2, w, b)


def _concat_pointwise_kernel(a_ref, b_ref, wa_ref, wb_ref, bias_ref, o_ref):
    """1x1 conv over a channel-concat of two inputs, without materializing
    the concat: out = relu(A @ Wa + B @ Wb + bias)."""
    acc = jnp.dot(a_ref[...], wa_ref[...], preferred_element_type=jnp.float32)
    acc = acc + jnp.dot(b_ref[...], wb_ref[...],
                        preferred_element_type=jnp.float32)
    o_ref[...] = jnp.maximum(acc + bias_ref[0, :], 0.0).astype(o_ref.dtype)


def concat_pointwise_conv(a2, b2, wa, wb, bias):
    R, Ca = a2.shape
    Cb = b2.shape[1]
    Cout = wa.shape[1]
    tr = _row_tile(R)
    return pl.pallas_call(
        _concat_pointwise_kernel,
        out_shape=jax.ShapeDtypeStruct((R, Cout), a2.dtype),
        grid=(R // tr,),
        in_specs=[
            pl.BlockSpec((tr, Ca), lambda i: (i, 0)),
            pl.BlockSpec((tr, Cb), lambda i: (i, 0)),
            pl.BlockSpec((Ca, Cout), lambda i: (0, 0)),
            pl.BlockSpec((Cb, Cout), lambda i: (0, 0)),
            pl.BlockSpec((1, Cout), lambda i: (0, 0)),
        ],
        out_specs=pl.BlockSpec((tr, Cout), lambda i: (i, 0)),
        compiler_params=pltpu.CompilerParams(
            dimension_semantics=("parallel",)),
    )(a2, b2, wa, wb, bias)


def _dense_conv_kernel(x_ref, w_ref, b_ref, o_ref):
    """Dense KxK conv (stride 1) + bias + ReLU, whole image per grid step.

    x_ref: (Hp, Wp, Cin) pre-padded; w_ref: (K*K, Cin, Cout); o_ref: (Ho, Wo, Cout).
    Each tap is a full (Ho*Wo, Cin)@(Cin, Cout) MXU matmul.
    """
    Ho, Wo, Cout = o_ref.shape
    Hp, Wp, Cin = x_ref.shape
    K = Hp - Ho + 1
    acc = jnp.zeros((Ho * Wo, Cout), jnp.float32)
    for kh in range(K):
        for kw in range(K):
            slab = x_ref[kh:kh + Ho, kw:kw + Wo, :].reshape(Ho * Wo, Cin)
            acc = acc + jnp.dot(slab, w_ref[kh * K + kw],
                                preferred_element_type=jnp.float32)
    acc = jnp.maximum(acc + b_ref[0, :], 0.0)
    o_ref[...] = acc.reshape(Ho, Wo, Cout).astype(o_ref.dtype)


def dense_conv(xp, w, b):
    """xp: (N, Hp, Wp, Cin) pre-padded; w: (K*K, Cin, Cout); b: (1, Cout)."""
    N, Hp, Wp, Cin = xp.shape
    KK, _, Cout = w.shape
    K = int(round(math.sqrt(KK)))
    Ho, Wo = Hp - K + 1, Wp - K + 1
    return pl.pallas_call(
        _dense_conv_kernel,
        out_shape=jax.ShapeDtypeStruct((N, Ho, Wo, Cout), xp.dtype),
        grid=(N,),
        in_specs=[
            pl.BlockSpec((None, Hp, Wp, Cin), lambda n: (n, 0, 0, 0)),
            pl.BlockSpec((KK, Cin, Cout), lambda n: (0, 0, 0)),
            pl.BlockSpec((1, Cout), lambda n: (0, 0)),
        ],
        out_specs=pl.BlockSpec((None, Ho, Wo, Cout), lambda n: (n, 0, 0, 0)),
        compiler_params=pltpu.CompilerParams(
            dimension_semantics=("parallel",)),
    )(xp, w, b)


# ----------------------------------------------------------------------------
# Layer wrappers (layout plumbing only; all math is inside the kernels)
# ----------------------------------------------------------------------------
def convdw_apply(p, x, stride):
    """ConvDW.forward_train with BN folded (mathematically identical)."""
    xp = jnp.pad(x, ((0, 0), (1, 1), (1, 1), (0, 0)))
    if stride == 1:
        return convdw_fused(xp, p["dw_w"], p["dw_b"], p["pw_w"], p["pw_b"])
    # stride 2: stride-1 depthwise then subsample (identical values), then 1x1.
    y = dw_conv3x3(xp, p["dw_w"], p["dw_b"])
    y = y[:, ::2, ::2, :]
    N, H, W, C = y.shape
    Cout = p["pw_w"].shape[1]
    z = pointwise_conv(y.reshape(N * H * W, C), p["pw_w"], p["pw_b"])
    return z.reshape(N, H, W, Cout)


def conv1x1_apply(p, x):
    N, H, W, Cin = x.shape
    Cout = p["w"].shape[1]
    y = pointwise_conv(x.reshape(N * H * W, Cin), p["w"], p["b"])
    return y.reshape(N, H, W, Cout)


def concat_conv1x1_apply(p, a, b):
    """conv1x1(torch.cat([a, b], channel)) without materializing the concat."""
    N, H, W, Ca = a.shape
    Cb = b.shape[-1]
    Cout = p["w"].shape[1]
    wa, wb = p["w"][:Ca], p["w"][Ca:]
    y = concat_pointwise_conv(a.reshape(N * H * W, Ca),
                              b.reshape(N * H * W, Cb), wa, wb, p["b"])
    return y.reshape(N, H, W, Cout)


def conv3x3_apply(p, x):
    xp = jnp.pad(x, ((0, 0), (1, 1), (1, 1), (0, 0)))
    return dense_conv(xp, p["w"], p["b"])


def upconv_apply(p, x):
    """ConvTranspose2d(k=4, s=2, p=1) + BN + ReLU.

    Equivalent to a stride-1 4x4 conv (flipped kernel) over the zero-dilated,
    edge-padded input; the dilate+pad is a single lax.pad with interior pad.
    """
    xp = lax.pad(x, jnp.zeros((), x.dtype),
                 ((0, 0, 0), (2, 2, 1), (2, 2, 1), (0, 0, 0)))
    return dense_conv(xp, p["w"], p["b"])


# ----------------------------------------------------------------------------
# Parameter construction (BN folded into conv weights, like fusing_layers())
# ----------------------------------------------------------------------------
def _bn_fold(key, c, eps=1e-5):
    k1, k2, k3, k4 = jax.random.split(key, 4)
    gamma = 1.0 + 0.1 * jax.random.normal(k1, (c,), jnp.float32)
    beta = 0.1 * jax.random.normal(k2, (c,), jnp.float32)
    mean = 0.1 * jax.random.normal(k3, (c,), jnp.float32)
    var = jax.random.uniform(k4, (c,), jnp.float32, 0.5, 1.5)
    scale = gamma / jnp.sqrt(var + eps)
    shift = beta - mean * scale
    return scale, shift


def make_convdw(key, in_ch, out_ch, stride, beta_reps):
    keys = iter(jax.random.split(key, 4 * beta_reps + 8))
    # depthwise stage: sum of beta dw3x3+BN branches (+ Identity+BN and
    # dw1x1+BN branches when stride == 1), folded into one dw conv.
    W_dw = jnp.zeros((in_ch, 3, 3), jnp.float32)
    B_dw = jnp.zeros((in_ch,), jnp.float32)
    for _ in range(beta_reps):
        w = 0.05 * jax.random.normal(next(keys), (in_ch, 3, 3), jnp.float32)
        s, sh = _bn_fold(next(keys), in_ch)
        W_dw = W_dw + w * s[:, None, None]
        B_dw = B_dw + sh
    if stride == 1:
        s, sh = _bn_fold(next(keys), in_ch)           # IdentityConv2D + BN
        W_dw = W_dw.at[:, 1, 1].add(s)
        B_dw = B_dw + sh
        w1 = 0.05 * jax.random.normal(next(keys), (in_ch,), jnp.float32)
        s, sh = _bn_fold(next(keys), in_ch)           # depthwise 1x1 + BN
        W_dw = W_dw.at[:, 1, 1].add(w1 * s)
        B_dw = B_dw + sh
    # fusion stage: sum of beta 1x1+BN branches (+ Identity+BN when square).
    W_pw = jnp.zeros((in_ch, out_ch), jnp.float32)
    B_pw = jnp.zeros((out_ch,), jnp.float32)
    for _ in range(beta_reps):
        w = (0.5 / math.sqrt(in_ch)) * jax.random.normal(
            next(keys), (out_ch, in_ch), jnp.float32)
        s, sh = _bn_fold(next(keys), out_ch)
        W_pw = W_pw + (w * s[:, None]).T
        B_pw = B_pw + sh
    if in_ch == out_ch:
        s, sh = _bn_fold(next(keys), out_ch)          # IdentityConv2D + BN
        W_pw = W_pw + jnp.diag(s)
        B_pw = B_pw + sh
    return dict(
        dw_w=jnp.transpose(W_dw, (1, 2, 0)).reshape(9, in_ch),
        dw_b=B_dw.reshape(1, in_ch),
        pw_w=W_pw,
        pw_b=B_pw.reshape(1, out_ch),
    )


def make_conv3x3(key, cin, cout):
    k1, k2 = jax.random.split(key)
    w = (1.0 / (3.0 * math.sqrt(cin))) * jax.random.normal(
        k1, (cout, cin, 3, 3), jnp.float32)
    s, sh = _bn_fold(k2, cout)
    wf = w * s[:, None, None, None]
    return dict(w=jnp.transpose(wf, (2, 3, 1, 0)).reshape(9, cin, cout),
                b=sh.reshape(1, cout))


def make_conv1x1(key, cin, cout):
    k1, k2 = jax.random.split(key)
    w = (1.0 / math.sqrt(cin)) * jax.random.normal(k1, (cout, cin), jnp.float32)
    s, sh = _bn_fold(k2, cout)
    return dict(w=(w * s[:, None]).T, b=sh.reshape(1, cout))


def make_upconv(key, cin, cout):
    k1, k2, k3 = jax.random.split(key, 3)
    wt = (1.0 / (4.0 * math.sqrt(cin))) * jax.random.normal(
        k1, (cin, cout, 4, 4), jnp.float32)
    bias = 0.1 * jax.random.normal(k2, (cout,), jnp.float32)
    s, sh = _bn_fold(k3, cout)
    wf = wt * s[None, :, None, None]
    # ConvTranspose2d(4,2,1) == zero-dilate(x) + pad(2) + conv w/ flipped kernel
    wflip = wf[:, :, ::-1, ::-1]
    return dict(w=jnp.transpose(wflip, (2, 3, 0, 1)).reshape(16, cin, cout),
                b=(bias * s + sh).reshape(1, cout))


def init_params(key, ch_in, beta=4):
    ks = iter(jax.random.split(key, 32))
    p = {}
    p["block1"] = make_convdw(next(ks), ch_in, 64, 2, beta)
    p["block2_0"] = make_convdw(next(ks), 64, 64, 1, beta)
    p["block2_1"] = make_convdw(next(ks), 64, 64, 2, beta)
    p["block3_0"] = make_convdw(next(ks), 64, 128, 1, beta)
    for i in range(1, 7):
        p[f"block3_{i}"] = make_convdw(next(ks), 128, 128, 1, beta)
    p["block3_7"] = make_convdw(next(ks), 128, 128, 2, beta)
    p["up1a"] = make_upconv(next(ks), 128, 256)
    p["up1c"] = make_conv1x1(next(ks), 256 + 64, 256)
    p["up1d"] = make_conv3x3(next(ks), 256, 256)
    p["up2a"] = make_upconv(next(ks), 256, 128)
    p["up2c"] = make_conv1x1(next(ks), 128 + 64, 128)
    p["up2d"] = make_conv3x3(next(ks), 128, 128)
    p["up3a"] = make_upconv(next(ks), 128, 64)
    p["up3b"] = make_conv1x1(next(ks), 64, 64)
    p["up3c"] = make_conv3x3(next(ks), 64, 64)
    p["classhead_0"] = make_conv3x3(next(ks), 64, 64)
    p["classhead_1"] = make_conv1x1(next(ks), 64, 20)
    return p


def mvlidarnet_forward(params, feat_nchw):
    x = jnp.transpose(feat_nchw, (0, 2, 3, 1))               # NCHW -> NHWC
    b1 = convdw_apply(params["block1"], x, stride=2)
    b2 = convdw_apply(params["block2_0"], b1, stride=1)
    b2 = convdw_apply(params["block2_1"], b2, stride=2)
    b3 = b2
    for i in range(7):
        b3 = convdw_apply(params[f"block3_{i}"], b3, stride=1)
    b3 = convdw_apply(params["block3_7"], b3, stride=2)
    u1a = upconv_apply(params["up1a"], b3)
    u1c = concat_conv1x1_apply(params["up1c"], u1a, b2)      # cat + 1x1 fused
    u1d = conv3x3_apply(params["up1d"], u1c)
    u2a = upconv_apply(params["up2a"], u1d)
    u2c = concat_conv1x1_apply(params["up2c"], u2a, b1)      # cat + 1x1 fused
    u2d = conv3x3_apply(params["up2d"], u2c)
    u3a = upconv_apply(params["up3a"], u2d)
    u3b = conv1x1_apply(params["up3b"], u3a)
    u3c = conv3x3_apply(params["up3c"], u3b)
    h = conv3x3_apply(params["classhead_0"], u3c)
    out = conv1x1_apply(params["classhead_1"], h)
    return jnp.transpose(out, (0, 3, 1, 2))                  # NHWC -> NCHW


if __name__ == "__main__":
    key = jax.random.PRNGKey(0)
    kp, kx = jax.random.split(key)

    ch_in, H, W = 8, 16, 16
    params = init_params(kp, ch_in, beta=4)
    feat = jax.random.normal(kx, (2, ch_in, H, W), dtype=jnp.float32)

    # --- self-check 1: depthwise kernel vs pure jnp ---
    xc = jax.random.normal(jax.random.PRNGKey(1), (1, 6, 6, 16), jnp.float32)
    wc = jax.random.normal(jax.random.PRNGKey(2), (9, 16), jnp.float32)
    bc = jax.random.normal(jax.random.PRNGKey(3), (1, 16), jnp.float32)
    got = dw_conv3x3(xc, wc, bc)
    ref = jnp.zeros((1, 4, 4, 16), jnp.float32)
    for kh in range(3):
        for kw in range(3):
            ref = ref + xc[:, kh:kh + 4, kw:kw + 4, :] * wc[3 * kh + kw]
    ref = jnp.maximum(ref + bc[0], 0.0)
    assert jnp.allclose(got, ref, atol=1e-4, rtol=1e-4), "dw3x3 mismatch"

    # --- self-check 2: fused ConvDW kernel vs pure jnp ---
    wpwc = 0.1 * jax.random.normal(jax.random.PRNGKey(4), (16, 32), jnp.float32)
    bpwc = 0.1 * jax.random.normal(jax.random.PRNGKey(5), (1, 32), jnp.float32)
    got_f = convdw_fused(xc, wc, bc, wpwc, bpwc)
    ref_f = jnp.maximum(ref.reshape(-1, 16) @ wpwc + bpwc[0], 0.0)
    ref_f = ref_f.reshape(1, 4, 4, 32)
    assert jnp.allclose(got_f, ref_f, atol=1e-3, rtol=1e-3), "fused ConvDW mismatch"

    # --- self-check 3: dense conv kernel vs pure jnp ---
    xd = jax.random.normal(jax.random.PRNGKey(6), (1, 6, 6, 8), jnp.float32)
    wd = 0.1 * jax.random.normal(jax.random.PRNGKey(7), (9, 8, 16), jnp.float32)
    bd = 0.1 * jax.random.normal(jax.random.PRNGKey(8), (1, 16), jnp.float32)
    got_d = dense_conv(xd, wd, bd)
    ref_d = jnp.zeros((1, 4, 4, 16), jnp.float32)
    for kh in range(3):
        for kw in range(3):
            ref_d = ref_d + jnp.einsum(
                "nhwc,cd->nhwd", xd[:, kh:kh + 4, kw:kw + 4, :], wd[3 * kh + kw])
    ref_d = jnp.maximum(ref_d + bd[0], 0.0)
    assert jnp.allclose(got_d, ref_d, atol=1e-3, rtol=1e-3), "dense conv mismatch"

    fwd = jax.jit(mvlidarnet_forward)
    out = fwd(params, feat)
    out = jax.block_until_ready(out)

    assert out.shape == (2, 20, H, W), out.shape
    assert bool(jnp.all(jnp.isfinite(out)))
    print("KERNEL_OK")
</pallas_src>

<mosaic_0001>
module attributes {stable_mosaic.version = 11 : i64} {
  func.func @_dw3x3_kernel(%arg0: i32, %arg1: memref<1x6x6x16xf32, #tpu.memory_space<vmem>>, %arg2: memref<9x16xf32, #tpu.memory_space<vmem>>, %arg3: memref<1x16xf32, #tpu.memory_space<vmem>>, %arg4: memref<1x4x4x16xf32, #tpu.memory_space<vmem>>) attributes {dimension_semantics = [#tpu.dimension_semantics<parallel>], iteration_bounds = array<i64: 1>, scalar_prefetch = 0 : i64, scratch_operands = 0 : i64, tpu.core_type = #tpu.core_type<tc>, window_params = [{transform_indices = @transform_0, window_bounds = array<i64: 1, 6, 6, 16>}, {pipeline_mode = #tpu.pipeline_mode<synchronous>, transform_indices = @transform_1, window_bounds = array<i64: 9, 16>}, {pipeline_mode = #tpu.pipeline_mode<synchronous>, transform_indices = @transform_2, window_bounds = array<i64: 1, 16>}, {transform_indices = @transform_3, window_bounds = array<i64: 1, 4, 4, 16>}]} {
    %cst = arith.constant 0.000000e+00 : f32
    %0 = vector.broadcast %cst : f32 to vector<4x4x16xf32>
    %c0 = arith.constant 0 : index
    %c0_0 = arith.constant 0 : index
    %c0_1 = arith.constant 0 : index
    %c0_2 = arith.constant 0 : index
    %1 = vector.load %arg1[%c0, %c0_0, %c0_1, %c0_2] : memref<1x6x6x16xf32, #tpu.memory_space<vmem>>, vector<1x4x4x16xf32>
    %2 = vector.shape_cast %1 : vector<1x4x4x16xf32> to vector<4x4x16xf32>
    %c0_3 = arith.constant 0 : index
    %c0_4 = arith.constant 0 : index
    %3 = vector.load %arg2[%c0_3, %c0_4] : memref<9x16xf32, #tpu.memory_space<vmem>>, vector<1x16xf32>
    %4 = vector.shape_cast %3 : vector<1x16xf32> to vector<16xf32>
    %5 = vector.shape_cast %4 : vector<16xf32> to vector<1x1x16xf32>
    %6 = vector.broadcast %5 : vector<1x1x16xf32> to vector<4x4x16xf32>
    %7 = arith.mulf %2, %6 : vector<4x4x16xf32>
    %8 = arith.addf %0, %7 : vector<4x4x16xf32>
    %c0_5 = arith.constant 0 : index
    %c0_6 = arith.constant 0 : index
    %c1 = arith.constant 1 : index
    %c0_7 = arith.constant 0 : index
    %9 = vector.load %arg1[%c0_5, %c0_6, %c1, %c0_7] : memref<1x6x6x16xf32, #tpu.memory_space<vmem>>, vector<1x4x4x16xf32>
    %10 = vector.shape_cast %9 : vector<1x4x4x16xf32> to vector<4x4x16xf32>
    %c1_8 = arith.constant 1 : index
    %c0_9 = arith.constant 0 : index
    %11 = vector.load %arg2[%c1_8, %c0_9] : memref<9x16xf32, #tpu.memory_space<vmem>>, vector<1x16xf32>
    %12 = vector.shape_cast %11 : vector<1x16xf32> to vector<16xf32>
    %13 = vector.shape_cast %12 : vector<16xf32> to vector<1x1x16xf32>
    %14 = vector.broadcast %13 : vector<1x1x16xf32> to vector<4x4x16xf32>
    %15 = arith.mulf %10, %14 : vector<4x4x16xf32>
    %16 = arith.addf %8, %15 : vector<4x4x16xf32>
    %c0_10 = arith.constant 0 : index
    %c0_11 = arith.constant 0 : index
    %c2 = arith.constant 2 : index
    %c0_12 = arith.constant 0 : index
    %17 = vector.load %arg1[%c0_10, %c0_11, %c2, %c0_12] : memref<1x6x6x16xf32, #tpu.memory_space<vmem>>, vector<1x4x4x16xf32>
    %18 = vector.shape_cast %17 : vector<1x4x4x16xf32> to vector<4x4x16xf32>
    %c2_13 = arith.constant 2 : index
    %c0_14 = arith.constant 0 : index
    %19 = vector.load %arg2[%c2_13, %c0_14] : memref<9x16xf32, #tpu.memory_space<vmem>>, vector<1x16xf32>
    %20 = vector.shape_cast %19 : vector<1x16xf32> to vector<16xf32>
    %21 = vector.shape_cast %20 : vector<16xf32> to vector<1x1x16xf32>
    %22 = vector.broadcast %21 : vector<1x1x16xf32> to vector<4x4x16xf32>
    %23 = arith.mulf %18, %22 : vector<4x4x16xf32>
    %24 = arith.addf %16, %23 : vector<4x4x16xf32>
    %c0_15 = arith.constant 0 : index
    %c1_16 = arith.constant 1 : index
    %c0_17 = arith.constant 0 : index
    %c0_18 = arith.constant 0 : index
    %25 = vector.load %arg1[%c0_15, %c1_16, %c0_17, %c0_18] : memref<1x6x6x16xf32, #tpu.memory_space<vmem>>, vector<1x4x4x16xf32>
    %26 = vector.shape_cast %25 : vector<1x4x4x16xf32> to vector<4x4x16xf32>
    %c3 = arith.constant 3 : index
    %c0_19 = arith.constant 0 : index
    %27 = vector.load %arg2[%c3, %c0_19] : memref<9x16xf32, #tpu.memory_space<vmem>>, vector<1x16xf32>
    %28 = vector.shape_cast %27 : vector<1x16xf32> to vector<16xf32>
    %29 = vector.shape_cast %28 : vector<16xf32> to vector<1x1x16xf32>
    %30 = vector.broadcast %29 : vector<1x1x16xf32> to vector<4x4x16xf32>
    %31 = arith.mulf %26, %30 : vector<4x4x16xf32>
    %32 = arith.addf %24, %31 : vector<4x4x16xf32>
    %c0_20 = arith.constant 0 : index
    %c1_21 = arith.constant 1 : index
    %c1_22 = arith.constant 1 : index
    %c0_23 = arith.constant 0 : index
    %33 = vector.load %arg1[%c0_20, %c1_21, %c1_22, %c0_23] : memref<1x6x6x16xf32, #tpu.memory_space<vmem>>, vector<1x4x4x16xf32>
    %34 = vector.shape_cast %33 : vector<1x4x4x16xf32> to vector<4x4x16xf32>
    %c4 = arith.constant 4 : index
    %c0_24 = arith.constant 0 : index
    %35 = vector.load %arg2[%c4, %c0_24] : memref<9x16xf32, #tpu.memory_space<vmem>>, vector<1x16xf32>
    %36 = vector.shape_cast %35 : vector<1x16xf32> to vector<16xf32>
    %37 = vector.shape_cast %36 : vector<16xf32> to vector<1x1x16xf32>
    %38 = vector.broadcast %37 : vector<1x1x16xf32> to vector<4x4x16xf32>
    %39 = arith.mulf %34, %38 : vector<4x4x16xf32>
    %40 = arith.addf %32, %39 : vector<4x4x16xf32>
    %c0_25 = arith.constant 0 : index
    %c1_26 = arith.constant 1 : index
    %c2_27 = arith.constant 2 : index
    %c0_28 = arith.constant 0 : index
    %41 = vector.load %arg1[%c0_25, %c1_26, %c2_27, %c0_28] : memref<1x6x6x16xf32, #tpu.memory_space<vmem>>, vector<1x4x4x16xf32>
    %42 = vector.shape_cast %41 : vector<1x4x4x16xf32> to vector<4x4x16xf32>
    %c5 = arith.constant 5 : index
    %c0_29 = arith.constant 0 : index
    %43 = vector.load %arg2[%c5, %c0_29] : memref<9x16xf32, #tpu.memory_space<vmem>>, vector<1x16xf32>
    %44 = vector.shape_cast %43 : vector<1x16xf32> to vector<16xf32>
    %45 = vector.shape_cast %44 : vector<16xf32> to vector<1x1x16xf32>
    %46 = vector.broadcast %45 : vector<1x1x16xf32> to vector<4x4x16xf32>
    %47 = arith.mulf %42, %46 : vector<4x4x16xf32>
    %48 = arith.addf %40, %47 : vector<4x4x16xf32>
    %c0_30 = arith.constant 0 : index
    %c2_31 = arith.constant 2 : index
    %c0_32 = arith.constant 0 : index
    %c0_33 = arith.constant 0 : index
    %49 = vector.load %arg1[%c0_30, %c2_31, %c0_32, %c0_33] : memref<1x6x6x16xf32, #tpu.memory_space<vmem>>, vector<1x4x4x16xf32>
    %50 = vector.shape_cast %49 : vector<1x4x4x16xf32> to vector<4x4x16xf32>
    %c6 = arith.constant 6 : index
    %c0_34 = arith.constant 0 : index
    %51 = vector.load %arg2[%c6, %c0_34] : memref<9x16xf32, #tpu.memory_space<vmem>>, vector<1x16xf32>
    %52 = vector.shape_cast %51 : vector<1x16xf32> to vector<16xf32>
    %53 = vector.shape_cast %52 : vector<16xf32> to vector<1x1x16xf32>
    %54 = vector.broadcast %53 : vector<1x1x16xf32> to vector<4x4x16xf32>
    %55 = arith.mulf %50, %54 : vector<4x4x16xf32>
    %56 = arith.addf %48, %55 : vector<4x4x16xf32>
    %c0_35 = arith.constant 0 : index
    %c2_36 = arith.constant 2 : index
    %c1_37 = arith.constant 1 : index
    %c0_38 = arith.constant 0 : index
    %57 = vector.load %arg1[%c0_35, %c2_36, %c1_37, %c0_38] : memref<1x6x6x16xf32, #tpu.memory_space<vmem>>, vector<1x4x4x16xf32>
    %58 = vector.shape_cast %57 : vector<1x4x4x16xf32> to vector<4x4x16xf32>
    %c7 = arith.constant 7 : index
    %c0_39 = arith.constant 0 : index
    %59 = vector.load %arg2[%c7, %c0_39] : memref<9x16xf32, #tpu.memory_space<vmem>>, vector<1x16xf32>
    %60 = vector.shape_cast %59 : vector<1x16xf32> to vector<16xf32>
    %61 = vector.shape_cast %60 : vector<16xf32> to vector<1x1x16xf32>
    %62 = vector.broadcast %61 : vector<1x1x16xf32> to vector<4x4x16xf32>
    %63 = arith.mulf %58, %62 : vector<4x4x16xf32>
    %64 = arith.addf %56, %63 : vector<4x4x16xf32>
    %c0_40 = arith.constant 0 : index
    %c2_41 = arith.constant 2 : index
    %c2_42 = arith.constant 2 : index
    %c0_43 = arith.constant 0 : index
    %65 = vector.load %arg1[%c0_40, %c2_41, %c2_42, %c0_43] : memref<1x6x6x16xf32, #tpu.memory_space<vmem>>, vector<1x4x4x16xf32>
    %66 = vector.shape_cast %65 : vector<1x4x4x16xf32> to vector<4x4x16xf32>
    %c8 = arith.constant 8 : index
    %c0_44 = arith.constant 0 : index
    %67 = vector.load %arg2[%c8, %c0_44] : memref<9x16xf32, #tpu.memory_space<vmem>>, vector<1x16xf32>
    %68 = vector.shape_cast %67 : vector<1x16xf32> to vector<16xf32>
    %69 = vector.shape_cast %68 : vector<16xf32> to vector<1x1x16xf32>
    %70 = vector.broadcast %69 : vector<1x1x16xf32> to vector<4x4x16xf32>
    %71 = arith.mulf %66, %70 : vector<4x4x16xf32>
    %72 = arith.addf %64, %71 : vector<4x4x16xf32>
    %c0_45 = arith.constant 0 : index
    %c0_46 = arith.constant 0 : index
    %73 = vector.load %arg3[%c0_45, %c0_46] : memref<1x16xf32, #tpu.memory_space<vmem>>, vector<1x16xf32>
    %74 = vector.shape_cast %73 : vector<1x16xf32> to vector<16xf32>
    %75 = vector.shape_cast %74 : vector<16xf32> to vector<1x1x16xf32>
    %76 = vector.broadcast %75 : vector<1x1x16xf32> to vector<4x4x16xf32>
    %77 = arith.addf %72, %76 : vector<4x4x16xf32>
    %cst_47 = arith.constant 0.000000e+00 : f32
    %78 = vector.broadcast %cst_47 : f32 to vector<4x4x16xf32>
    %79 = arith.maximumf %77, %78 : vector<4x4x16xf32>
    %c0_48 = arith.constant 0 : index
    %c0_49 = arith.constant 0 : index
    %c0_50 = arith.constant 0 : index
    %c0_51 = arith.constant 0 : index
    %80 = vector.load %arg4[%c0_48, %c0_49, %c0_50, %c0_51] : memref<1x4x4x16xf32, #tpu.memory_space<vmem>>, vector<1x4x4x16xf32>
    %81 = vector.shape_cast %80 : vector<1x4x4x16xf32> to vector<4x4x16xf32>
    %82 = vector.shape_cast %79 : vector<4x4x16xf32> to vector<1x4x4x16xf32>
    tpu.vector_store %arg4[%c0_48, %c0_49, %c0_50, %c0_51], %82 {strides = array<i32>} : memref<1x4x4x16xf32, #tpu.memory_space<vmem>>, vector<1x4x4x16xf32>,
    return
  }
  func.func @transform_0(%arg0: i32) -> (i32, i32, i32, i32) {
    %c0_i32 = arith.constant 0 : i32
    %c0_i32_0 = arith.constant 0 : i32
    %c0_i32_1 = arith.constant 0 : i32
    %c0_i32_2 = arith.constant 0 : i32
    return %arg0, %c0_i32, %c0_i32_0, %c0_i32_1 : i32, i32, i32, i32
  }
  func.func @transform_1(%arg0: i32) -> (i32, i32) {
    %c0_i32 = arith.constant 0 : i32
    %c0_i32_0 = arith.constant 0 : i32
    %c0_i32_1 = arith.constant 0 : i32
    return %c0_i32, %c0_i32_0 : i32, i32
  }
  func.func @transform_2(%arg0: i32) -> (i32, i32) {
    %c0_i32 = arith.constant 0 : i32
    %c0_i32_0 = arith.constant 0 : i32
    %c0_i32_1 = arith.constant 0 : i32
    return %c0_i32, %c0_i32_0 : i32, i32
  }
  func.func @transform_3(%arg0: i32) -> (i32, i32, i32, i32) {
    %c0_i32 = arith.constant 0 : i32
    %c0_i32_0 = arith.constant 0 : i32
    %c0_i32_1 = arith.constant 0 : i32
    %c0_i32_2 = arith.constant 0 : i32
    return %arg0, %c0_i32, %c0_i32_0, %c0_i32_1 : i32, i32, i32, i32
  }
}

</mosaic_0001>

<bundles_post_ra>
// kernel: tpu_custom_call.1
= control target key start
LH: loop header
LB: loop body
LE: loop exit
PB: predicated region body
PF: predicated region fallthrough
CT: control target
= control target key end

     0   :  { %s481_s0 = inlined_call_operand.vmem [shape: f32[1,6,6,16], index: 0, kind: input, shape index: {}]   ;;  %s482_s1 = inlined_call_operand.vmem [shape: f32[9,16], index: 1, kind: input, shape index: {}]   ;;  %s483_s2 = inlined_call_operand.vmem [shape: f32[1,16], index: 2, kind: input, shape index: {}]   ;;  %s484_s3 = inlined_call_operand.hbm [shape: f32[1,4,4,16], index: 3, kind: output, shape index: {}]  }
   0x1   :  { %v15_v0 = vld [vmem:[%s481_s0] sm:$0xf]  ;;  %v209_v9 = vld [vmem:[%s481_s0 + $0x8] sm:$0xf]  ;;  %v326_v12 = vld [vmem:[%s482_s1 + $0x4] ss:$0 sm:$0xff] }
   0x2   :  { %v294_v1 = vld [vmem:[%s482_s1] ss:$0 sm:$0xff]  ;;  %v32_v2 = vld [vmem:[%s481_s0 + $0x1] sm:$0xf]  ;;  %v214_v11 = vld [vmem:[%s481_s0 + $0x9] sm:$0xf] }
   0x3   :  { %v24_v3 = vmul.f32 %v294_v1, %v15_v0  ;;  %v207_v4 = vld [vmem:[%s482_s1 + $0x1] ss:$0 sm:$0xff]  ;;  %v49_v5 = vld [vmem:[%s481_s0 + $0x2] sm:$0xf]  ;;  %v219_v15 = vld [vmem:[%s481_s0 + $0xa] sm:$0xf]  ;;  %v93_v18 = vmul.f32 %v326_v12, %v214_v11 }
   0x4   :  { %v309_v6 = vld [vmem:[%s482_s1 + $0x2] ss:$0 sm:$0xff]  ;;  %v41_v7 = vmul.f32 %v207_v4, %v32_v2  ;;  %v318_v10 = vld [vmem:[%s482_s1 + $0x3] ss:$0 sm:$0xff]  ;;  %v335_v16 = vld [vmem:[%s482_s1 + $0x5] ss:$0 sm:$0xff] }
   0x5   :  { %v58_v8 = vmul.f32 %v309_v6, %v49_v5  ;;  %v76_v14 = vmul.f32 %v318_v10, %v209_v9  ;;  %v224_v19 = vld [vmem:[%s481_s0 + $0x10] sm:$0xf]  ;;  %v344_v20 = vld [vmem:[%s482_s1 + $0x6] ss:$0 sm:$0xff]  ;;  %v16_v21 = vld [vmem:[%s481_s0 + $0x8] sm:$0xf]  ;;  %v110_v28 = vmul.f32 %v335_v16, %v219_v15 }
   0x6   :  { %v45_v13 = vadd.f32 %v41_v7, %v24_v3  ;;  %v229_v22 = vld [vmem:[%s481_s0 + $0x11] sm:$0xf]  ;;  %v25_v23 = vmul.f32 %v294_v1, %v16_v21  ;;  %v33_v24 = vld [vmem:[%s481_s0 + $0x9] sm:$0xf]  ;;  %v366_v29 = vld [vmem:[%s482_s1 + $0x7] ss:$0 sm:$0xff]  ;;  %v128_v38 = vmul.f32 %v344_v20, %v224_v19 }
   0x7   :  { %v50_v25 = vld [vmem:[%s481_s0 + $0xa] sm:$0xf]  ;;  %v210_v26 = vld [vmem:[%s481_s0 + $0x10] sm:$0xf]  ;;  %v374_v31 = vld [vmem:[%s482_s1 + $0x8] ss:$0 sm:$0xff]  ;;  %v42_v32 = vmul.f32 %v207_v4, %v33_v24  ;;  %v145_v48 = vmul.f32 %v366_v29, %v229_v22 }
   0x8   :  { %v62_v17 = vadd.f32 %v58_v8, %v45_v13  ;;  %v234_v30 = vld [vmem:[%s481_s0 + $0x12] sm:$0xf]  ;;  %v59_v33 = vmul.f32 %v309_v6, %v50_v25  ;;  %v77_v40 = vmul.f32 %v318_v10, %v210_v26  ;;  %v211_v43 = vld [vmem:[%s481_s0 + $0x18] sm:$0xf]  ;;  %v212_v60 = vld [vmem:[%s481_s0 + $0x20] sm:$0xf] }
   0x9   :  { %v215_v34 = vld [vmem:[%s481_s0 + $0x11] sm:$0xf]  ;;  %v46_v39 = vadd.f32 %v42_v32, %v25_v23  ;;  %v225_v51 = vld [vmem:[%s481_s0 + $0x18] sm:$0xf]  ;;  %v162_v54 = vmul.f32 %v374_v31, %v234_v30  ;;  %v78_v57 = vmul.f32 %v318_v10, %v211_v43  ;;  %v217_v11 = vld [vmem:[%s481_s0 + $0x21] sm:$0xf] }
   0xa   :  { %v80_v27 = vadd.f32 %v76_v14, %v62_v17  ;;  %v220_v35 = vld [vmem:[%s481_s0 + $0x12] sm:$0xf]  ;;  %v94_v50 = vmul.f32 %v326_v12, %v215_v34  ;;  %v216_v52 = vld [vmem:[%s481_s0 + $0x19] sm:$0xf]  ;;  %v129_v5 = vmul.f32 %v344_v20, %v225_v51 }
   0xb   :  { %v17_v36 = vld [vmem:[%s481_s0 + $0x10] sm:$0xf]  ;;  %v63_v49 = vadd.f32 %v59_v33, %v46_v39  ;;  %v18_v53 = vld [vmem:[%s481_s0 + $0x18] sm:$0xf]  ;;  %v111_v55 = vmul.f32 %v335_v16, %v220_v35  ;;  %v95_v8 = vmul.f32 %v326_v12, %v216_v52 }
   0xc   :  { %v97_v37 = vadd.f32 %v93_v18, %v80_v27  ;;  %v34_v41 = vld [vmem:[%s481_s0 + $0x11] sm:$0xf]  ;;  %v26_v44 = vmul.f32 %v294_v1, %v17_v36  ;;  %v35_v58 = vld [vmem:[%s481_s0 + $0x19] sm:$0xf]  ;;  %v27_v2 = vmul.f32 %v294_v1, %v18_v53 }
   0xd   :  { %v51_v42 = vld [vmem:[%s481_s0 + $0x12] sm:$0xf]  ;;  %v43_v45 = vmul.f32 %v207_v4, %v34_v41  ;;  %v52_v59 = vld [vmem:[%s481_s0 + $0x1a] sm:$0xf]  ;;  %v81_v62 = vadd.f32 %v77_v40, %v63_v49  ;;  %v44_v3 = vmul.f32 %v207_v4, %v35_v58 }
   0xe   :  { %v60_v46 = vmul.f32 %v309_v6, %v51_v42  ;;  %v114_v47 = vadd.f32 %v110_v28, %v97_v37  ;;  %v230_v63 = vld [vmem:[%s481_s0 + $0x19] sm:$0xf]  ;;  %v61_v9 = vmul.f32 %v309_v6, %v52_v59 }
   0xf   :  { %v47_v56 = vadd.f32 %v43_v45, %v26_v44  ;;  %v221_v0 = vld [vmem:[%s481_s0 + $0x1a] sm:$0xf] }
  0x10   :  { %v132_v61 = vadd.f32 %v128_v38, %v114_v47 }
  0x11   :  { %v64_v7 = vadd.f32 %v60_v46, %v47_v56 }
  0x12   :  { %8 = vsyncpa [#allocation3], 0  ;;  %v149_v13 = vadd.f32 %v145_v48, %v132_v61  ;;  %v98_v14 = vadd.f32 %v94_v50, %v81_v62  ;;  %v235_v15 = vld [vmem:[%s481_s0 + $0x1a] sm:$0xf]  ;;  %v226_v1 = vld [vmem:[%s481_s0 + $0x20] sm:$0xf]  ;;  %v48_v4 = vadd.f32 %v44_v3, %v27_v2  ;;  %v79_v17 = vmul.f32 %v318_v10, %v212_v60 }
  0x13   :  { %v239_v6 = vld [vmem:[%s483_s2] ss:$0 sm:$0xff]  ;;  %v146_v18 = vmul.f32 %v366_v29, %v230_v63  ;;  %v82_v19 = vadd.f32 %v78_v57, %v64_v7  ;;  %v112_v21 = vmul.f32 %v335_v16, %v221_v0  ;;  %v222_v22 = vld [vmem:[%s481_s0 + $0x22] sm:$0xf]  ;;  %v96_v26 = vmul.f32 %v326_v12, %v217_v11  ;;  %v227_v32 = vld [vmem:[%s481_s0 + $0x28] sm:$0xf] }
  0x14   :  { %v166_v23 = vadd.f32 %v162_v54, %v149_v13  ;;  %v115_v24 = vadd.f32 %v111_v55, %v98_v14  ;;  %v231_v25 = vld [vmem:[%s481_s0 + $0x21] sm:$0xf]  ;;  %v65_v10 = vadd.f32 %v61_v9, %v48_v4  ;;  %v163_v27 = vmul.f32 %v374_v31, %v235_v15  ;;  %v232_v39 = vld [vmem:[%s481_s0 + $0x29] sm:$0xf] }
  0x15   :  { %v99_v28 = vadd.f32 %v95_v8, %v82_v19  ;;  %v130_v30 = vmul.f32 %v344_v20, %v226_v1  ;;  %v236_v35 = vld [vmem:[%s481_s0 + $0x22] sm:$0xf]  ;;  %v113_v37 = vmul.f32 %v335_v16, %v222_v22  ;;  %vm185_vm0 = vcmask 125952   ;;  %v237_v16 = vld [vmem:[%s481_s0 + $0x2a] sm:$0xf]  ;;  %s265_s0 = smov [#allocation2]  }
  0x16   :  { %v177_v33 = vadd.f32 %v239_v6, %v166_v23  ;;  %v133_v34 = vadd.f32 %v129_v5, %v115_v24  ;;  %v83_v36 = vadd.f32 %v79_v17, %v65_v10  ;;  %v147_v38 = vmul.f32 %v366_v29, %v231_v25  ;;  %s195_s20 = sshll.u32 %s265_s0, 4  ;;  %s196_s20 = int_to_ptr.vmem [resolvable:$true] %s195_s20 }
  0x17   :  { %v116_v12 = vadd.f32 %v112_v21, %v99_v28  ;;  %v131_v43 = vmul.f32 %v344_v20, %v227_v32  ;;  %v164_v45 = vmul.f32 %v374_v31, %v236_v35  ;;  %v148_v48 = vmul.f32 %v366_v29, %v232_v39  ;;  %s243_s21 = scalar_lea.vmem %s196_s20, 256  ;;  %p248_p1 = scmp.lt.s32.totalorder %s196_s20, %s196_s20 }
  0x18   :  { %v181_v40 = vmax.f32 %v177_v33, 0.0  ;;  %v150_v41 = vadd.f32 %v146_v18, %v133_v34  ;;  %v100_v42 = vadd.f32 %v96_v26, %v83_v36  ;;  %v165_v52 = vmul.f32 %v374_v31, %v237_v16  ;;  %p244_p0 = scmp.ne.s32.totalorder %s196_s20, %s243_s21  ;;  %p249_p2 = scmp.lt.s32.totalorder %s243_s21, %s243_s21 }
  0x19   :  { %v134_v44 = vadd.f32 %v130_v30, %v116_v12 }
  0x1a   :  { %186 = vst.msk [vmem:[#allocation2] sm:$0xf] %vm185_vm0, %v181_v40  ;;  %v167_v46 = vadd.f32 %v163_v27, %v150_v41  ;;  %v117_v47 = vadd.f32 %v113_v37, %v100_v42  ;;  %p250_p3 = por %p249_p2, %p248_p1 }
  0x1b   :  { %v151_v49 = vadd.f32 %v147_v38, %v134_v44 }
  0x1c   :  { %v178_v50 = vadd.f32 %v239_v6, %v167_v46  ;;  %v135_v51 = vadd.f32 %v131_v43, %v117_v47  ;;  %p251_p4 = pnand %p250_p3, %p244_p0 }
  0x1d   :  { %v168_v53 = vadd.f32 %v164_v45, %v151_v49 }
  0x1e   :  { %v182_v20 = vmax.f32 %v178_v50, 0.0  ;;  %v152_v54 = vadd.f32 %v148_v48, %v135_v51 }
  0x1f   :  { %v179_v55 = vadd.f32 %v239_v6, %v168_v53 }
  0x20   :  { %187 = vst.msk [vmem:[#allocation2 + $0x4] sm:$0xf] %vm185_vm0, %v182_v20  ;;  %v169_v56 = vadd.f32 %v165_v52, %v152_v54 }
  0x21   :  { %v183_v57 = vmax.f32 %v179_v55, 0.0 }
  0x22   :  { %v180_v58 = vadd.f32 %v239_v6, %v169_v56 }
  0x23   :  { %188 = vst.msk [vmem:[#allocation2 + $0x8] sm:$0xf] %vm185_vm0, %v183_v57 }
  0x24   :  { %v184_v59 = vmax.f32 %v180_v58, 0.0 }
  0x26   :  { %189 = vst.msk [vmem:[#allocation2 + $0xc] sm:$0xf] %vm185_vm0, %v184_v59 }
  0x27   :  { %254 = shalt.err (!%p251_p4)
}
  0x28   :  { %s266_s22 = smov 64   ;;  %s267_s23 = smov 4  }
  0x29   :  { %201 = dma.vmem_to_hbm [thread:$0]  %s196_s20, 256, %s484_s3, [#allocation3], %s266_s22, %s266_s22, %s267_s23  }
  0x2a   :  { %263 = dma.done.wait [#allocation3], 256  }
  0x2b   :  { %264 = vsyncadd [#allocation3], 4294967040 }
  0x2c   :  { %205 = vsyncpa [#allocation3], 1 }

</bundles_post_ra>
